<compile_context>
chip_gen: v7x
topology: tpu7x:2x2x1
jax: 0.10.0
libtpu: 0.0.40
codegen_flags: <defaults>
</compile_context>

<pallas_src>
import functools

import jax
import jax.numpy as jnp
from jax import lax
from jax.experimental import pallas as pl
from jax.experimental.pallas import tpu as pltpu


def _round_up(x, m):
    return (x + m - 1) // m * m


def _pad2d(a, rows, cols):
    return jnp.pad(a, ((0, rows - a.shape[0]), (0, cols - a.shape[1])))


def pack_params(w1, b1, w2, b2, w3, b3):
    """Pack all weights/biases (pre-transposed) into one f32 buffer (single DMA).

    Weights come in as (in_features, out_features); biases (out_features,).
    Stored for the transposed (feature-major, batch-on-lanes) compute:
      * each fc1 weight column w1[k, :] as its own (fc1, 1) segment (VPU FMA),
      * biases as (features, 1) columns,
      * w2 / w3 transposed: (out_features, in_features).
    Every segment starts at an 8-row (sublane) boundary.
    """
    input_dim, fc1 = w1.shape
    fc1_b, fc2 = w2.shape
    fc2_b, n_ret = w3.shape
    assert fc1 == fc1_b and fc2 == fc2_b
    assert n_ret == 2, "epilogue assumes [mean, softplus(pre_std)]"

    lanes = max(fc1, fc2, input_dim, 8)
    segs, offs, row = [], {}, 0

    def add(name, a):
        nonlocal row
        offs[name] = row
        rows = _round_up(a.shape[0], 8)
        segs.append(_pad2d(a.astype(jnp.float32), rows, lanes))
        row += rows

    for k in range(input_dim):                       # fc1 columns for the VPU FMA
        add(f"w1c{k}", w1[k, :].reshape(fc1, 1))
    add("b1", b1.reshape(fc1, 1))
    add("w2t", w2.T)                                 # (fc2, fc1)
    add("b2", b2.reshape(fc2, 1))
    add("w3t", w3.T)                                 # (n_ret, fc2)
    add("b3", b3.reshape(n_ret, 1))

    packed = jnp.concatenate(segs, axis=0)
    dims = (input_dim, fc1, fc2, n_ret)
    return packed, offs, dims


def _policy_kernel(x_ref, p_ref, o_ref, *, dims, offs):
    """One batch tile, transposed: x (input_dim, Bt) -> o (2, Bt)."""
    input_dim, fc1, fc2, n_ret = dims
    x = x_ref[...]                                             # (input_dim, Bt)

    # fc1: outer-product FMA on the VPU (contraction dim == input_dim == 2).
    h = p_ref[offs["b1"]:offs["b1"] + fc1, 0:1]                # (fc1, 1) bias column
    for k in range(input_dim):                                 # static unroll
        wk = p_ref[offs[f"w1c{k}"]:offs[f"w1c{k}"] + fc1, 0:1]  # (fc1, 1)
        h = h + wk * x[k:k + 1, :]                             # -> (fc1, Bt)
    # leaky_relu(negative_slope=1) == identity: no op emitted.

    # fc2: MXU matmul in the transposed layout.
    w2t = p_ref[offs["w2t"]:offs["w2t"] + fc2, 0:fc1]          # (fc2, fc1)
    h = jnp.dot(w2t, h, preferred_element_type=jnp.float32) \
        + p_ref[offs["b2"]:offs["b2"] + fc2, 0:1]
    # leaky_relu(negative_slope=1) == identity: no op emitted.

    # fc3.
    w3t = p_ref[offs["w3t"]:offs["w3t"] + n_ret, 0:fc2]        # (n_ret, fc2)
    y = jnp.dot(w3t, h, preferred_element_type=jnp.float32) \
        + p_ref[offs["b3"]:offs["b3"] + n_ret, 0:1]            # (n_ret, Bt)

    # Row 0 (mean) passes through raw; only row 1 gets the single-branch stable
    # softplus: max(y,0) + log1p(exp(-|y|)).  Lane-dense (Bt % 128 == 0) stores.
    o_ref[0:1, :] = y[0:1, :]
    y1 = y[1:2, :]
    o_ref[1:2, :] = jnp.maximum(y1, 0.0) + jnp.log1p(jnp.exp(-jnp.abs(y1)))


def _auto_block_b(B, max_block_b):
    # Fat tiles to amortize per-grid-step overhead, but keep >= 2 grid steps
    # when the batch allows it so v7x's two TensorCores both get work.
    half = _round_up(max(1, (B + 1) // 2), 128)
    return max(128, min(max_block_b, half))


def policy_network_batch(obs, packed, offs, dims, *, block_b=None, max_block_b=2048):
    """obs: (B, input_dim) -> (B, 2) rows of [mean, softplus(pre_std)]."""
    input_dim, _, _, n_ret = dims
    B = obs.shape[0]
    if block_b is None:
        block_b = _auto_block_b(B, max_block_b)
    assert block_b % 128 == 0

    obs_t = obs.astype(jnp.float32).T                          # (input_dim, B)
    Bp = _round_up(B, block_b)
    if Bp != B:
        obs_t = jnp.pad(obs_t, ((0, 0), (0, Bp - B)))
    pack_rows, pack_lanes = packed.shape

    kernel = functools.partial(_policy_kernel, dims=dims, offs=offs)
    out_t = pl.pallas_call(
        kernel,
        out_shape=jax.ShapeDtypeStruct((n_ret, Bp), jnp.float32),
        grid=(Bp // block_b,),
        in_specs=[
            pl.BlockSpec((input_dim, block_b), lambda i: (0, i)),   # 2 contiguous rows / tile
            pl.BlockSpec((pack_rows, pack_lanes), lambda i: (0, 0)),  # params VMEM-resident
        ],
        out_specs=pl.BlockSpec((n_ret, block_b), lambda i: (0, i)),  # (2, block_b) writeback
        compiler_params=pltpu.CompilerParams(
            dimension_semantics=("parallel",)),   # v7x: both TensorCores share the batch
    )(obs_t, packed)
    return out_t[:, :B].T                                      # (B, 2); tiny slice/transpose


def policy_network_forward(observation, packed, offs, dims):
    """Exact PyTorch PolicyNetwork.forward semantics: (input_dim,) -> (2,)."""
    input_dim, _, _, n_ret = dims
    out = policy_network_batch(observation.reshape(1, input_dim), packed, offs, dims)
    # cat([x[:, 0], softplus(x[:, 1])], dim=-1) with batch 1 -> (2,)
    return out.reshape(n_ret)


def _init_linear(key, fan_in, fan_out):
    """Deterministic init matching nn.Linear's U(-1/sqrt(fan_in), 1/sqrt(fan_in))."""
    kw, kb = jax.random.split(key)
    bound = 1.0 / jnp.sqrt(jnp.float32(fan_in))
    w = jax.random.uniform(kw, (fan_in, fan_out), jnp.float32, -bound, bound)
    b = jax.random.uniform(kb, (fan_out,), jnp.float32, -bound, bound)
    return w, b


def _reference(obs2d, w1, b1, w2, b2, w3, b3):
    hi = lax.Precision.HIGHEST
    h = jnp.dot(obs2d, w1, precision=hi) + b1   # leaky_relu slope=1 == identity
    h = jnp.dot(h, w2, precision=hi) + b2
    y = jnp.dot(h, w3, precision=hi) + b3
    return jnp.stack([y[:, 0], jax.nn.softplus(y[:, 1])], axis=-1)


if __name__ == "__main__":
    # PolicyNetwork(lr=..., input_dims=(2,), fc1_dims=32, fc2_dims=32, n_returns=2)
    input_dim, fc1_dims, fc2_dims, n_returns = 2, 32, 32, 2

    key = jax.random.PRNGKey(0)
    k_obs, k_batch, k_big, k1, k2, k3 = jax.random.split(key, 6)

    w1, b1 = _init_linear(k1, input_dim, fc1_dims)
    w2, b2 = _init_linear(k2, fc1_dims, fc2_dims)
    w3, b3 = _init_linear(k3, fc2_dims, n_returns)
    packed, offs, dims = pack_params(w1, b1, w2, b2, w3, b3)   # one-time pack, 1 DMA / call

    # --- single-observation path (exact nn.Module.forward semantics) ---
    observation = jax.random.normal(k_obs, (input_dim,), jnp.float32)  # (wealth, time-left)
    out1 = jax.block_until_ready(policy_network_forward(observation, packed, offs, dims))
    ref1 = _reference(observation.reshape(1, input_dim),
                      w1, b1, w2, b2, w3, b3).reshape(n_returns)
    assert out1.shape == (n_returns,)
    assert jnp.allclose(out1, ref1, atol=1e-4, rtol=1e-4)

    # --- batched path: B=256 -> block_b=128, 2 grid steps (both v7x TCs busy) ---
    B = 256
    obs_batch = jax.random.normal(k_batch, (B, input_dim), jnp.float32)
    out_b = jax.block_until_ready(policy_network_batch(obs_batch, packed, offs, dims))
    ref_b = _reference(obs_batch, w1, b1, w2, b2, w3, b3)
    assert out_b.shape == (B, n_returns)
    assert jnp.allclose(out_b, ref_b, atol=1e-4, rtol=1e-4)

    # --- fat-tile path: B=2048 -> block_b=1024, still 2 grid steps ---
    B2 = 2048
    obs_big = jax.random.normal(k_big, (B2, input_dim), jnp.float32)
    out_big = jax.block_until_ready(policy_network_batch(obs_big, packed, offs, dims))
    ref_big = _reference(obs_big, w1, b1, w2, b2, w3, b3)
    assert out_big.shape == (B2, n_returns)
    assert jnp.allclose(out_big, ref_big, atol=1e-4, rtol=1e-4)

    print("KERNEL_OK")
</pallas_src>

<mosaic_0001>
module attributes {stable_mosaic.version = 11 : i64} {
  func.func @_policy_kernel(%arg0: i32, %arg1: memref<2x128xf32, #tpu.memory_space<vmem>>, %arg2: memref<176x32xf32, #tpu.memory_space<vmem>>, %arg3: memref<2x128xf32, #tpu.memory_space<vmem>>) attributes {dimension_semantics = [#tpu.dimension_semantics<parallel>], iteration_bounds = array<i64: 1>, scalar_prefetch = 0 : i64, scratch_operands = 0 : i64, tpu.core_type = #tpu.core_type<tc>, window_params = [{transform_indices = @transform_0, window_bounds = array<i64: 2, 128>}, {pipeline_mode = #tpu.pipeline_mode<synchronous>, transform_indices = @transform_1, window_bounds = array<i64: 176, 32>}, {transform_indices = @transform_2, window_bounds = array<i64: 2, 128>}]} {
    %c0 = arith.constant 0 : index
    %c0_0 = arith.constant 0 : index
    %0 = vector.load %arg1[%c0, %c0_0] : memref<2x128xf32, #tpu.memory_space<vmem>>, vector<2x128xf32>
    %c64 = arith.constant 64 : index
    %c0_1 = arith.constant 0 : index
    %1 = vector.load %arg2[%c64, %c0_1] : memref<176x32xf32, #tpu.memory_space<vmem>>, vector<32x1xf32>
    %c0_2 = arith.constant 0 : index
    %c0_3 = arith.constant 0 : index
    %2 = vector.load %arg2[%c0_2, %c0_3] : memref<176x32xf32, #tpu.memory_space<vmem>>, vector<32x1xf32>
    %3 = vector.extract_strided_slice %0 {offsets = [0, 0], sizes = [1, 128], strides = [1, 1]} : vector<2x128xf32> to vector<1x128xf32>
    %4 = vector.broadcast %2 : vector<32x1xf32> to vector<32x128xf32>
    %5 = vector.broadcast %3 : vector<1x128xf32> to vector<32x128xf32>
    %6 = arith.mulf %4, %5 : vector<32x128xf32>
    %7 = vector.broadcast %1 : vector<32x1xf32> to vector<32x128xf32>
    %8 = arith.addf %7, %6 : vector<32x128xf32>
    %c32 = arith.constant 32 : index
    %c0_4 = arith.constant 0 : index
    %9 = vector.load %arg2[%c32, %c0_4] : memref<176x32xf32, #tpu.memory_space<vmem>>, vector<32x1xf32>
    %10 = vector.extract_strided_slice %0 {offsets = [1, 0], sizes = [1, 128], strides = [1, 1]} : vector<2x128xf32> to vector<1x128xf32>
    %11 = vector.broadcast %9 : vector<32x1xf32> to vector<32x128xf32>
    %12 = vector.broadcast %10 : vector<1x128xf32> to vector<32x128xf32>
    %13 = arith.mulf %11, %12 : vector<32x128xf32>
    %14 = arith.addf %8, %13 : vector<32x128xf32>
    %c96 = arith.constant 96 : index
    %c0_5 = arith.constant 0 : index
    %15 = vector.load %arg2[%c96, %c0_5] : memref<176x32xf32, #tpu.memory_space<vmem>>, vector<32x32xf32>
    %cst = arith.constant dense<0.000000e+00> : vector<32x128xf32>
    %16 = tpu.matmul %15, %14, %cst {dimension_numbers = #tpu.dot_dimension_numbers<[1], [0], [0], [1], [0, 0, 1, 1], [], []>} : vector<32x32xf32>, vector<32x128xf32>, vector<32x128xf32> -> vector<32x128xf32>
    %c128 = arith.constant 128 : index
    %c0_6 = arith.constant 0 : index
    %17 = vector.load %arg2[%c128, %c0_6] : memref<176x32xf32, #tpu.memory_space<vmem>>, vector<32x1xf32>
    %18 = vector.broadcast %17 : vector<32x1xf32> to vector<32x128xf32>
    %19 = arith.addf %16, %18 : vector<32x128xf32>
    %c160 = arith.constant 160 : index
    %c0_7 = arith.constant 0 : index
    %20 = vector.load %arg2[%c160, %c0_7] : memref<176x32xf32, #tpu.memory_space<vmem>>, vector<2x32xf32>
    %cst_8 = arith.constant dense<0.000000e+00> : vector<2x128xf32>
    %21 = tpu.matmul %20, %19, %cst_8 {dimension_numbers = #tpu.dot_dimension_numbers<[1], [0], [0], [1], [0, 0, 1, 1], [], []>} : vector<2x32xf32>, vector<32x128xf32>, vector<2x128xf32> -> vector<2x128xf32>
    %c168 = arith.constant 168 : index
    %c0_9 = arith.constant 0 : index
    %22 = vector.load %arg2[%c168, %c0_9] : memref<176x32xf32, #tpu.memory_space<vmem>>, vector<2x1xf32>
    %23 = vector.broadcast %22 : vector<2x1xf32> to vector<2x128xf32>
    %24 = arith.addf %21, %23 : vector<2x128xf32>
    %25 = vector.extract_strided_slice %24 {offsets = [0, 0], sizes = [1, 128], strides = [1, 1]} : vector<2x128xf32> to vector<1x128xf32>
    %c0_10 = arith.constant 0 : index
    %c0_11 = arith.constant 0 : index
    %26 = vector.load %arg3[%c0_10, %c0_11] : memref<2x128xf32, #tpu.memory_space<vmem>>, vector<1x128xf32>
    tpu.vector_store %arg3[%c0_10, %c0_11], %25 {strides = array<i32>} : memref<2x128xf32, #tpu.memory_space<vmem>>, vector<1x128xf32>,
    %27 = vector.extract_strided_slice %24 {offsets = [1, 0], sizes = [1, 128], strides = [1, 1]} : vector<2x128xf32> to vector<1x128xf32>
    %cst_12 = arith.constant 0.000000e+00 : f32
    %28 = vector.broadcast %cst_12 : f32 to vector<1x128xf32>
    %29 = arith.maximumf %27, %28 : vector<1x128xf32>
    %30 = math.absf %27 : vector<1x128xf32>
    %cst_13 = arith.constant 0.000000e+00 : f32
    %31 = vector.broadcast %cst_13 : f32 to vector<1x128xf32>
    %32 = arith.subf %31, %30 : vector<1x128xf32>
    %33 = math.exp %32 : vector<1x128xf32>
    %34 = math.log1p %33 : vector<1x128xf32>
    %35 = arith.addf %29, %34 : vector<1x128xf32>
    %c1 = arith.constant 1 : index
    %c0_14 = arith.constant 0 : index
    %36 = vector.load %arg3[%c1, %c0_14] : memref<2x128xf32, #tpu.memory_space<vmem>>, vector<1x128xf32>
    tpu.vector_store %arg3[%c1, %c0_14], %35 {strides = array<i32>} : memref<2x128xf32, #tpu.memory_space<vmem>>, vector<1x128xf32>,
    return
  }
  func.func @transform_0(%arg0: i32) -> (i32, i32) {
    %c0_i32 = arith.constant 0 : i32
    %c0_i32_0 = arith.constant 0 : i32
    return %c0_i32, %arg0 : i32, i32
  }
  func.func @transform_1(%arg0: i32) -> (i32, i32) {
    %c0_i32 = arith.constant 0 : i32
    %c0_i32_0 = arith.constant 0 : i32
    %c0_i32_1 = arith.constant 0 : i32
    return %c0_i32, %c0_i32_0 : i32, i32
  }
  func.func @transform_2(%arg0: i32) -> (i32, i32) {
    %c0_i32 = arith.constant 0 : i32
    %c0_i32_0 = arith.constant 0 : i32
    return %c0_i32, %arg0 : i32, i32
  }
}

</mosaic_0001>

<bundles_post_ra>
// kernel: tpu_custom_call.1
= control target key start
LH: loop header
LB: loop body
LE: loop exit
PB: predicated region body
PF: predicated region fallthrough
CT: control target
= control target key end

     0   :  { %v438_v2 = vmov 0   ;;  %s544_s0 = inlined_call_operand.vmem [shape: f32[2,128], index: 0, kind: input, shape index: {}]   ;;  %s545_s1 = inlined_call_operand.vmem [shape: f32[176,32], index: 1, kind: input, shape index: {}]   ;;  %s546_s2 = inlined_call_operand.hbm [shape: f32[2,128], index: 2, kind: output, shape index: {}]  }
   0x1   :  { %v17_v0 = vld [vmem:[%s545_s1] sm:$0xff]  ;;  %409 = vset.pattern.permute.xlu1 %v438_v2  ;;  %408 = vset.pattern.permute.xlu0 %v438_v2  ;;  %v18_v3 = vld [vmem:[%s545_s1 + $0x8] sm:$0xff] }
   0x2   :  { %v13_v1 = vld [vmem:[%s545_s1 + $0x40] sm:$0xff]  ;;  %23 = vperm.xlu0 %408, %v17_v0   ;;  %v14_v4 = vld [vmem:[%s545_s1 + $0x48] sm:$0xff] }
   0x3   :  { %51 = vperm.xlu1 %409, %v13_v1  }
   0x6   :  { %28 = vperm.xlu0 %408, %v18_v3  }
   0x7   :  { %56 = vperm.xlu1 %409, %v14_v4  }
   0x8   :  { %7 = vsyncpa [#allocation3], 0  ;;  %v73_v5 = vld [vmem:[%s545_s1 + $0x20] sm:$0xff]  ;;  %v74_v6 = vld [vmem:[%s545_s1 + $0x28] sm:$0xff]  ;;  %vm137_vm0 = vcmask 261120   ;;  %v41_v19 = vlaneseq  ;;  %v439_v59 = vmov 0.0|0.0  }
   0x9   :  { %v19_v7 = vld [vmem:[%s545_s1 + $0x10] sm:$0xff]  ;;  %v20_v8 = vld [vmem:[%s545_s1 + $0x18] sm:$0xff]  ;;  %v113_v13 = vld [vmem:[%s545_s1 + $0x80] sm:$0xff]  ;;  %397 = vmatprep.subr.bf16.mxu1 %v439_v59  ;;  %vm440_vm1 = vmmov 0   ;;  %v441_v60 = vmov 0.0  }
   0xa   :  { %79 = vperm.xlu0 %408, %v73_v5   ;;  %v15_v9 = vld [vmem:[%s545_s1 + $0x50] sm:$0xff]  ;;  %v16_v10 = vld [vmem:[%s545_s1 + $0x58] sm:$0xff]  ;;  %v114_v14 = vld [vmem:[%s545_s1 + $0x88] sm:$0xff]  ;;  %v42_v20 = vshrl.u32 %v41_v19, 7  ;;  %386 = vmatprep.mubr.msk.f32.mxu1 %vm440_vm1, %v441_v60 }
   0xb   :  { %84 = vperm.xlu1 %409, %v74_v6   ;;  %v75_v11 = vld [vmem:[%s545_s1 + $0x30] sm:$0xff]  ;;  %v76_v12 = vld [vmem:[%s545_s1 + $0x38] sm:$0xff]  ;;  %v109_v17 = vld [vmem:[%s545_s1 + $0x60] sm:$0xff] }
   0xc   :  { %v115_v15 = vld [vmem:[%s545_s1 + $0x90] sm:$0xff]  ;;  %v116_v16 = vld [vmem:[%s545_s1 + $0x98] sm:$0xff]  ;;  %v236_v18 = vld [vmem:[%s545_s1 + $0xa8] sm:$0x3]  ;;  %372 = vmatprep.mubr.msk.f32.mxu0 %vm137_vm0, %v109_v17  ;;  %v43_v21 = vsub.s32 0, %v42_v20  ;;  %v99_v26 = vsub.s32 1, %v42_v20 }
   0xd   :  { %v12_v22 = vld [vmem:[%s544_s0] sm:$0x3]  ;;  %v110_v56 = vld [vmem:[%s545_s1 + $0x68] sm:$0xff]  ;;  %v111_v57 = vld [vmem:[%s545_s1 + $0x70] sm:$0xff] }
   0xe   :  { %33 = vperm.xlu0 %408, %v19_v7   ;;  %v44_v25 = vrot.slane %v12_v22, %v43_v21  ;;  %v100_v31 = vrot.slane %v12_v22, %v99_v26  ;;  %v112_v58 = vld [vmem:[%s545_s1 + $0x78] sm:$0xff] }
   0xf   :  { %38 = vperm.xlu1 %409, %v20_v8  }
  0x12   :  { %61 = vperm.xlu0 %408, %v15_v9  }
  0x13   :  { %66 = vperm.xlu1 %409, %v16_v10  }
  0x16   :  { %89 = vperm.xlu0 %408, %v75_v11   ;;  %v235_v11 = vld [vmem:[%s545_s1 + $0xa0] sm:$0x3]  ;;  %s442_s1 = smov [#allocation2]  }
  0x17   :  { %94 = vperm.xlu1 %409, %v76_v12   ;;  %s338_s26 = sshll.u32 %s442_s1, 4  ;;  %s339_s26 = int_to_ptr.vmem [resolvable:$true] %s338_s26 }
  0x18   :  { %s414_s27 = scalar_lea.vmem %s339_s26, 32  ;;  %p419_p1 = scmp.lt.s32.totalorder %s339_s26, %s339_s26 }
  0x19   :  { %p415_p0 = scmp.ne.s32.totalorder %s339_s26, %s414_s27  ;;  %p420_p2 = scmp.lt.s32.totalorder %s414_s27, %s414_s27 }
  0x1a   :  { %119 = vperm.xlu0 %408, %v113_v13  }
  0x1b   :  { %124 = vperm.xlu1 %409, %v114_v14   ;;  %p421_p3 = por %p420_p2, %p419_p1 }
  0x1d   :  { %p422_p4 = pnand %p421_p3, %p415_p0 }
  0x1e   :  { %129 = vperm.xlu0 %408, %v115_v15  }
  0x1f   :  { %134 = vperm.xlu1 %409, %v116_v16  }
  0x22   :  { %239 = vperm.xlu0 %408, %v236_v18  }
  0x81   :  { %v24_v23 = vpop.permute.xlu0 %23 }
  0x82   :  { %v52_v24 = vpop.permute.xlu1 %51  ;;  %v45_v29 = vmul.f32 %v44_v25, %v24_v23 }
  0x84   :  { %v69_v34 = vadd.f32 %v52_v24, %v45_v29 }
  0x85   :  { %v29_v27 = vpop.permute.xlu0 %28 }
  0x86   :  { %v57_v28 = vpop.permute.xlu1 %56  ;;  %v46_v30 = vmul.f32 %v44_v25, %v29_v27 }
  0x88   :  { %v70_v35 = vadd.f32 %v57_v28, %v46_v30 }
  0x89   :  { %v80_v32 = vpop.permute.xlu0 %79 }
  0x8a   :  { %v85_v33 = vpop.permute.xlu1 %84  ;;  %v101_v36 = vmul.f32 %v100_v31, %v80_v32 }
  0x8b   :  { %v102_v37 = vmul.f32 %v100_v31, %v85_v33 }
  0x8c   :  { %v105_v38 = vadd.f32 %v101_v36, %v69_v34 }
  0x8d   :  { %v106_v39 = vadd.f32 %v102_v37, %v70_v35  ;;  %v34_v40 = vpop.permute.xlu0 %33 }
  0x8e   :  { %v39_v41 = vpop.permute.xlu1 %38  ;;  %v47_v45 = vmul.f32 %v44_v25, %v34_v40 }
  0x8f   :  { %v389_v42 = vpack.c.bf16 %v106_v39, %v105_v38  ;;  %v48_v46 = vmul.f32 %v44_v25, %v39_v41 }
  0x91   :  { %390 = vmatprep.subr.bf16.mxu0 %v389_v42  ;;  %v62_v43 = vpop.permute.xlu0 %61 }
  0x92   :  { %v67_v44 = vpop.permute.xlu1 %66  ;;  %392 = vmatpush3.bf16.msra.mxu0 %v389_v42  ;;  %v71_v49 = vadd.f32 %v62_v43, %v47_v45 }
  0x93   :  { %v72_v50 = vadd.f32 %v67_v44, %v48_v46 }
  0x95   :  { %v90_v47 = vpop.permute.xlu0 %89 }
  0x96   :  { %v95_v48 = vpop.permute.xlu1 %94  ;;  %v103_v51 = vmul.f32 %v100_v31, %v90_v47 }
  0x97   :  { %v104_v52 = vmul.f32 %v100_v31, %v95_v48 }
  0x98   :  { %v107_v53 = vadd.f32 %v103_v51, %v71_v49 }
  0x99   :  { %v108_v54 = vadd.f32 %v104_v52, %v72_v50  ;;  %v120_v62 = vpop.permute.xlu0 %119 }
  0x9a   :  { %v125_v61 = vpop.permute.xlu1 %124 }
  0x9b   :  { %v393_v55 = vpack.c.bf16 %v108_v54, %v107_v53 }
  0x9d   :  { %394 = vmatprep.subr.bf16.mxu0 %v393_v55  ;;  %v130_v6 = vpop.permute.xlu0 %129 }
  0x9e   :  { %396 = vmatpush3.bf16.msra.mxu0 %v393_v55  ;;  %v135_v3 = vpop.permute.xlu1 %134 }
  0xa1   :  { %373 = vmatmul.mubr.msk.f32.vlgmr.msra.gmra.mrb[0].mxu0 %vm137_vm0, %v110_v56  ;;  %v240_v12 = vpop.permute.xlu0 %239 }
  0xa2   :  { %375 = vmatprep.mubr.msk.f32.mxu0 %vm137_vm0, %v111_v57 }
  0xa5   :  { %376 = vmatmul.mubr.msk.f32.gmra.mrb[2].mxu0 %vm137_vm0, %v112_v58 }
 0x174   :  { %v374_v63 = vpop.f32.mrb[0].mxu0 }
 0x175   :  { %v222_v0 = vadd.f32 %v374_v63, %v125_v61  ;;  %v216_v1 = vpop.f32.mrb[1].mxu0 }
 0x176   :  { %v217_v2 = vadd.f32 %v216_v1, %v120_v62 }
 0x178   :  { %v377_v4 = vpop.f32.mrb[2].mxu0  ;;  %v398_v5 = vpack.c.bf16 %v222_v0, %v217_v2 }
 0x179   :  { %v232_v7 = vadd.f32 %v377_v4, %v135_v3  ;;  %v226_v8 = vpop.f32.mrb[3].mxu0 }
 0x17a   :  { %v227_v9 = vadd.f32 %v226_v8, %v130_v6  ;;  %399 = vmatpush3.bf16.msra.mxu1 %v398_v5 }
 0x17b   :  { %400 = vmatprep.subr.bf16.mxu1 %v439_v59 }
 0x17c   :  { %v401_v10 = vpack.c.bf16 %v232_v7, %v227_v9 }
 0x17e   :  { %402 = vmatpush3.bf16.msra.mxu1 %v401_v10 }
 0x181   :  { %387 = vmatmul.mubr.msk.f32.vlgmr.msra.gmra.mrb[0].mxu1 %vm137_vm0, %v235_v11 }
 0x254   :  { %v311_v13 = vpop.f32.mrb[0].mxu1 }
 0x255   :  { %v312_v14 = vadd.f32 %v311_v13, %v240_v12  ;;  %v388_v15 = vpop.f32.mrb[1].mxu1 }
 0x257   :  { %v317_v16 = vand.u32 2147483647, %v312_v14  ;;  %315 = vst [vmem:[#allocation2] sm:$0x1] %v312_v14  ;;  %v316_v27 = vmax.f32 %v312_v14, 0.0 }
 0x259   :  { %v318_v17 = vsub.f32 0.0, %v317_v16 }
 0x25b   :  { %v319_v18 = vmul.f32 1.442695, %v318_v17 }
 0x25d   :  { %410 = vpow2.f32 %v319_v18 }
 0x267   :  { %v411_v19 = vpop.eup %410 }
 0x268   :  { %v321_v20 = vadd.f32 1.0, %v411_v19  ;;  %v324_v21 = vmul.f32 -0.5, %v411_v19  ;;  %v327_v23 = vand.u32 2147483647, %v411_v19 }
 0x26a   :  { %412 = vlog2.f32 %v321_v20  ;;  %v325_v22 = vadd.f32 1.0, %v324_v21  ;;  %vm328_vm2 = vcmp.lt.f32.partialorder %v327_v23, 0.0004427343 }
 0x26c   :  { %v326_v26 = vmul.f32 %v411_v19, %v325_v22 }
 0x274   :  { %v413_v24 = vpop.eup %412 }
 0x275   :  { %v323_v25 = vmul.f32 0.6931472, %v413_v24 }
 0x277   :  { %v329_v28 = vsel %vm328_vm2, %v326_v26, %v323_v25 }
 0x278   :  { %v330_v29 = vadd.f32 %v329_v28, %v316_v27 }
 0x27a   :  { %331 = vst [vmem:[#allocation2] sm:$0x2] %v330_v29 }
 0x27b   :  { %425 = shalt.err (!%p422_p4)
}
 0x27c   :  { %s426_s30 = scalar_lea.hbm %s546_s2, 32 }
 0x27d   :  { %p427_p5 = scmp.ne.s32.totalorder %s546_s2, %s426_s30  ;;  %p430_p6 = scmp.lt.u32.totalorder %s426_s30, %s546_s2 }
 0x27f   :  { %p432_p7 = pnand %p430_p6, %p427_p5 }
 0x281   :  { %435 = shalt.err (!%p432_p7)
}
 0x282   :  { %341 = dma.vmem_to_hbm [thread:$0]  %s339_s26, 32, %s546_s2, [#allocation3]  }
 0x283   :  { %436 = dma.done.wait [#allocation3], 32  }
 0x284   :  { %437 = vsyncadd [#allocation3], 4294967264 }
 0x285   :  { %345 = vsyncpa [#allocation3], 1 }

</bundles_post_ra>
